<compile_context>
chip_gen: v5e
topology: v5e:2x2
jax: 0.10.0
libtpu: 0.0.40
codegen_flags: <defaults>
</compile_context>

<pallas_src>
import functools

import jax
import jax.numpy as jnp
from jax.experimental import pallas as pl
from jax.experimental.pallas import tpu as pltpu


def _round_up(n, m):
    return ((n + m - 1) // m) * m


def _mlp_kernel(x_ref, w1_ref, w2t_ref, b2_ref, o_ref, *, out_size):
    # Layer 1 on the MXU; b1 is already folded into w1 via the ones-column of x.
    h = jnp.dot(x_ref[...], w1_ref[...], preferred_element_type=jnp.float32)
    h = jnp.maximum(h, 0.0)                                  # ReLU (VPU)

    # Layer 2 on VPU + XLU: out_size is tiny (2 for CartPole), so one broadcast
    # multiply with each W2 row followed by a lane reduction per logit.
    w2t = w2t_ref[...]                                       # (out, hidden)
    cols = []
    for j in range(out_size):                                # static, unrolled
        wj = w2t[j:j + 1, :]                                 # (1, hidden)
        cols.append(jnp.sum(h * wj, axis=-1, keepdims=True))  # (bm, 1)
    logits = jnp.concatenate(cols, axis=-1) + b2_ref[...]    # (bm, out)
    o_ref[...] = logits.astype(o_ref.dtype)


@functools.partial(jax.jit, static_argnames=("block_rows",))
def policy_gradient_net_forward(x, w1, b1, w2, b2, *, block_rows=512):
    """relu(x @ w1 + b1) @ w2 + b2 for a (B, in) batch of observations."""
    batch, in_size = x.shape
    hidden = w1.shape[1]
    out_size = w2.shape[1]

    # Fold b1 into W1 (ones-column trick); pre-transpose W2 -> (out, hidden) so the
    # kernel can broadcast each output row along the lane axis.
    x32 = x.astype(jnp.float32)
    x_aug = jnp.concatenate([x32, jnp.ones((batch, 1), jnp.float32)], axis=1)
    w1_aug = jnp.concatenate(
        [w1.astype(jnp.float32), b1.reshape(1, hidden).astype(jnp.float32)], axis=0)
    w2t = w2.astype(jnp.float32).T                           # (out, hidden)
    b2_row = b2.reshape(1, out_size).astype(jnp.float32)

    # Batch tile: big enough to amortize per-step overhead, multiple of 8 sublanes.
    bm = _round_up(min(block_rows, _round_up(batch, 8)), 8)
    padded = _round_up(batch, bm)
    if padded != batch:
        x_aug = jnp.pad(x_aug, ((0, padded - batch), (0, 0)))
    grid = (padded // bm,)

    kaug = in_size + 1
    cost = pl.CostEstimate(
        flops=2 * padded * (kaug * hidden + hidden * out_size),
        transcendentals=0,
        bytes_accessed=4 * (padded * kaug + kaug * hidden + out_size * hidden
                            + out_size + padded * out_size),
    )

    out = pl.pallas_call(
        functools.partial(_mlp_kernel, out_size=out_size),
        out_shape=jax.ShapeDtypeStruct((padded, out_size), jnp.float32),
        grid=grid,
        in_specs=[
            pl.BlockSpec((bm, kaug), lambda i: (i, 0)),           # streamed batch tiles
            pl.BlockSpec((kaug, hidden), lambda i: (0, 0)),       # resident W1 (+b1 row)
            pl.BlockSpec((out_size, hidden), lambda i: (0, 0)),   # resident W2^T
            pl.BlockSpec((1, out_size), lambda i: (0, 0)),        # resident b2
        ],
        out_specs=pl.BlockSpec((bm, out_size), lambda i: (i, 0)),
        compiler_params=pltpu.CompilerParams(
            dimension_semantics=("parallel",)),
        cost_estimate=cost,
    )(x_aug, w1_aug, w2t, b2_row)

    return out[:batch] if padded != batch else out


def init_params(key, input_size, hidden_size, output_size):
    """Deterministic init mimicking nn.Linear's default (uniform +- 1/sqrt(fan_in))."""
    k1, k2, k3, k4 = jax.random.split(key, 4)
    bound1 = 1.0 / jnp.sqrt(jnp.float32(input_size))
    bound2 = 1.0 / jnp.sqrt(jnp.float32(hidden_size))
    w1 = jax.random.uniform(k1, (input_size, hidden_size), jnp.float32, -bound1, bound1)
    b1 = jax.random.uniform(k2, (1, hidden_size), jnp.float32, -bound1, bound1)
    w2 = jax.random.uniform(k3, (hidden_size, output_size), jnp.float32, -bound2, bound2)
    b2 = jax.random.uniform(k4, (1, output_size), jnp.float32, -bound2, bound2)
    return w1, b1, w2, b2


def _reference(x, w1, b1, w2, b2):
    h = jnp.maximum(jnp.dot(x, w1, precision=jax.lax.Precision.HIGHEST) + b1, 0.0)
    return jnp.dot(h, w2, precision=jax.lax.Precision.HIGHEST) + b2


if __name__ == "__main__":
    # CartPole: observation dim 4, action dim 2; hidden = 128 per the module.
    INPUT_SIZE, HIDDEN_SIZE, OUTPUT_SIZE = 4, 128, 2
    BATCH = 1024  # a whole rollout of observations per call (kernel is latency-bound at B=8)

    key = jax.random.PRNGKey(0)
    kx, kp = jax.random.split(key)
    x = jax.random.normal(kx, (BATCH, INPUT_SIZE), jnp.float32)
    w1, b1, w2, b2 = init_params(kp, INPUT_SIZE, HIDDEN_SIZE, OUTPUT_SIZE)

    out = policy_gradient_net_forward(x, w1, b1, w2, b2)
    out = jax.block_until_ready(out)
    assert out.shape == (BATCH, OUTPUT_SIZE)
    ref = _reference(x, w1, b1, w2, b2)
    assert jnp.allclose(out, ref, atol=1e-4, rtol=1e-4)

    # Also exercise the padding path (batch not a multiple of the tile / of 8).
    xs = x[:7]
    outs = jax.block_until_ready(policy_gradient_net_forward(xs, w1, b1, w2, b2))
    refs = _reference(xs, w1, b1, w2, b2)
    assert outs.shape == (7, OUTPUT_SIZE)
    assert jnp.allclose(outs, refs, atol=1e-4, rtol=1e-4)

    print("KERNEL_OK")
</pallas_src>

<mosaic_0001>
module attributes {stable_mosaic.version = 11 : i64} {
  func.func @_mlp_kernel(%arg0: i32, %arg1: memref<512x5xf32, #tpu.memory_space<vmem>>, %arg2: memref<5x128xf32, #tpu.memory_space<vmem>>, %arg3: memref<2x128xf32, #tpu.memory_space<vmem>>, %arg4: memref<1x2xf32, #tpu.memory_space<vmem>>, %arg5: memref<512x2xf32, #tpu.memory_space<vmem>>) attributes {dimension_semantics = [#tpu.dimension_semantics<parallel>], iteration_bounds = array<i64: 2>, scalar_prefetch = 0 : i64, scratch_operands = 0 : i64, tpu.core_type = #tpu.core_type<tc>, window_params = [{transform_indices = @transform_0, window_bounds = array<i64: 512, 5>}, {pipeline_mode = #tpu.pipeline_mode<synchronous>, transform_indices = @transform_1, window_bounds = array<i64: 5, 128>}, {pipeline_mode = #tpu.pipeline_mode<synchronous>, transform_indices = @transform_2, window_bounds = array<i64: 2, 128>}, {pipeline_mode = #tpu.pipeline_mode<synchronous>, transform_indices = @transform_3, window_bounds = array<i64: 1, 2>}, {transform_indices = @transform_4, window_bounds = array<i64: 512, 2>}]} {
    %c0 = arith.constant 0 : index
    %c0_0 = arith.constant 0 : index
    %0 = vector.load %arg1[%c0, %c0_0] : memref<512x5xf32, #tpu.memory_space<vmem>>, vector<512x5xf32>
    %c0_1 = arith.constant 0 : index
    %c0_2 = arith.constant 0 : index
    %1 = vector.load %arg2[%c0_1, %c0_2] : memref<5x128xf32, #tpu.memory_space<vmem>>, vector<5x128xf32>
    %cst = arith.constant dense<0.000000e+00> : vector<512x128xf32>
    %2 = tpu.matmul %0, %1, %cst {dimension_numbers = #tpu.dot_dimension_numbers<[1], [0], [0], [1], [0, 0, 1, 1], [], []>} : vector<512x5xf32>, vector<5x128xf32>, vector<512x128xf32> -> vector<512x128xf32>
    %cst_3 = arith.constant 0.000000e+00 : f32
    %3 = vector.broadcast %cst_3 : f32 to vector<512x128xf32>
    %4 = arith.maximumf %2, %3 : vector<512x128xf32>
    %c0_4 = arith.constant 0 : index
    %c0_5 = arith.constant 0 : index
    %5 = vector.load %arg3[%c0_4, %c0_5] : memref<2x128xf32, #tpu.memory_space<vmem>>, vector<2x128xf32>
    %6 = vector.extract_strided_slice %5 {offsets = [0, 0], sizes = [1, 128], strides = [1, 1]} : vector<2x128xf32> to vector<1x128xf32>
    %7 = vector.broadcast %6 : vector<1x128xf32> to vector<512x128xf32>
    %8 = arith.mulf %4, %7 : vector<512x128xf32>
    %cst_6 = arith.constant dense<0.000000e+00> : vector<512xf32>
    %9 = vector.multi_reduction <add>, %8, %cst_6 [1] : vector<512x128xf32> to vector<512xf32>
    %10 = vector.shape_cast %9 : vector<512xf32> to vector<512x1xf32>
    %11 = vector.extract_strided_slice %5 {offsets = [1, 0], sizes = [1, 128], strides = [1, 1]} : vector<2x128xf32> to vector<1x128xf32>
    %12 = vector.broadcast %11 : vector<1x128xf32> to vector<512x128xf32>
    %13 = arith.mulf %4, %12 : vector<512x128xf32>
    %cst_7 = arith.constant dense<0.000000e+00> : vector<512xf32>
    %14 = vector.multi_reduction <add>, %13, %cst_7 [1] : vector<512x128xf32> to vector<512xf32>
    %15 = vector.shape_cast %14 : vector<512xf32> to vector<512x1xf32>
    %16 = tpu.concatenate %10, %15 in 1 : vector<512x1xf32>, vector<512x1xf32> -> vector<512x2xf32>
    %c0_8 = arith.constant 0 : index
    %c0_9 = arith.constant 0 : index
    %17 = vector.load %arg4[%c0_8, %c0_9] : memref<1x2xf32, #tpu.memory_space<vmem>>, vector<1x2xf32>
    %18 = vector.broadcast %17 : vector<1x2xf32> to vector<512x2xf32>
    %19 = arith.addf %16, %18 : vector<512x2xf32>
    %c0_10 = arith.constant 0 : index
    %c0_11 = arith.constant 0 : index
    %20 = vector.load %arg5[%c0_10, %c0_11] : memref<512x2xf32, #tpu.memory_space<vmem>>, vector<512x2xf32>
    tpu.vector_store %arg5[%c0_10, %c0_11], %19 {strides = array<i32>} : memref<512x2xf32, #tpu.memory_space<vmem>>, vector<512x2xf32>,
    return
  }
  func.func @transform_0(%arg0: i32) -> (i32, i32) {
    %c0_i32 = arith.constant 0 : i32
    %c0_i32_0 = arith.constant 0 : i32
    return %arg0, %c0_i32 : i32, i32
  }
  func.func @transform_1(%arg0: i32) -> (i32, i32) {
    %c0_i32 = arith.constant 0 : i32
    %c0_i32_0 = arith.constant 0 : i32
    %c0_i32_1 = arith.constant 0 : i32
    return %c0_i32, %c0_i32_0 : i32, i32
  }
  func.func @transform_2(%arg0: i32) -> (i32, i32) {
    %c0_i32 = arith.constant 0 : i32
    %c0_i32_0 = arith.constant 0 : i32
    %c0_i32_1 = arith.constant 0 : i32
    return %c0_i32, %c0_i32_0 : i32, i32
  }
  func.func @transform_3(%arg0: i32) -> (i32, i32) {
    %c0_i32 = arith.constant 0 : i32
    %c0_i32_0 = arith.constant 0 : i32
    %c0_i32_1 = arith.constant 0 : i32
    return %c0_i32, %c0_i32_0 : i32, i32
  }
  func.func @transform_4(%arg0: i32) -> (i32, i32) {
    %c0_i32 = arith.constant 0 : i32
    %c0_i32_0 = arith.constant 0 : i32
    return %arg0, %c0_i32 : i32, i32
  }
}

</mosaic_0001>

<bundles_post_ra>
// kernel: policy_gradient_net_forward.1
= control target key start
LH: loop header
LB: loop body
LE: loop exit
PB: predicated region body
PF: predicated region fallthrough
CT: control target
= control target key end

     0   :  { %s1499_s15 = smov 0   ;;  %s2313_s0 = inlined_call_operand.vmem [shape: f32[1024,5], index: 0, kind: input, shape index: {}]   ;;  %s2314_s1 = inlined_call_operand.vmem [shape: f32[5,128], index: 1, kind: input, shape index: {}]   ;;  %s2315_s2 = inlined_call_operand.vmem [shape: f32[2,128], index: 2, kind: input, shape index: {}]   ;;  %s2316_s3 = inlined_call_operand.vmem [shape: f32[1,2], index: 3, kind: input, shape index: {}]   ;;  %s2317_s4 = inlined_call_operand.vmem [shape: f32[1024,2], index: 4, kind: output, shape index: {}]  }
   0x1 LB: > { %s1377_s16 = sadd.s32 4294967295, %s1472_s15   ;;  %p1381_p0 = scmp.ge.s32.totalorder %s1472_s15, 1  ;;  %s1472_s15 = sphi %s1499_s15, %s14_s15  }
   0x2   : > { %p163_p1 = scmp.lt.s32.totalorder %s1472_s15, 3 }
   0x4   : > { %p164_p2 = pnand %p1381_p0, %p163_p1 }
   0x5   : > { %s1382_s19 = sshll.u32 (!%p164_p2), %s1377_s16, 6 }
   0x6   : > { %167 = sbr.rel (%p164_p2) target bundleno = 603 (0x25b), region = 36  ;;  %p190_p3 = scmp.lt.s32.totalorder (!%p164_p2), %s1382_s19, 127 }
   0xb   : > { %v265_v0 = vld [vmem:[%s2314_s1] sm:$0x1f]  ;;  %vm459_vm0 = vcmask 1044480   ;;  %s2355_s19 = smov (!%p190_p3, %s1382_s19), 127  ;;  %vm266_vm1 = vcmask 39936   ;;  %vm1123_vm2 = vcmask 7168  }
   0xc   : > { %1386 = vmatpush.msk.msra.mxu0 %vm459_vm0, %v265_v0  ;;  %1453 = vmatpush.msk.msra.mxu1 %vm459_vm0, %v265_v0  ;;  %s1383_s20 = sshll.u32 %s2355_s19, 3  ;;  %v736_v39 = vld [vmem:[%s2315_s2] sm:$0x3]  ;;  %vm1256_vm3 = vcmask 15360  }
   0xd   : > { %1454 = vmatpush.msk.msra.mxu2 %vm459_vm0, %v265_v0  ;;  %1455 = vmatpush.msk.msra.mxu3 %vm459_vm0, %v265_v0  ;;  %s1518_s23 = scalar_lea.vmem %s2313_s0, %s1383_s20  ;;  %v1601_v42 = vperm.slane %v736_v39, 1  ;;  %v1603_v43 = vperm.slane %v736_v39, 0  ;;  %s1758_s30 = scalar_lea.vmem %s2317_s4, %s1383_s20 }
   0xe   : > { %v201_v1 = vld [vmem:[%s1518_s23] sm:$0xff]  ;;  %v218_v5 = vld [vmem:[%s1518_s23 + $0x88] sm:$0xff]  ;;  %v203_v9 = vld [vmem:[%s1518_s23 + $0x10] sm:$0xff] }
   0xf   : > { %v217_v2 = vld [vmem:[%s1518_s23 + $0x80] sm:$0xff]  ;;  %1387 = vmatmul.msk.f32.vlgmr.msra.gmra.mxu0 %vm266_vm1, %v201_v1  ;;  %v202_v6 = vld [vmem:[%s1518_s23 + $0x8] sm:$0xff]  ;;  %v219_v10 = vld [vmem:[%s1518_s23 + $0x90] sm:$0xff] }
  0x10   : > { %v233_v3 = vld [vmem:[%s1518_s23 + $0x100] sm:$0xff]  ;;  %1403 = vmatmul.msk.f32.vlgmr.msra.gmra.mxu1 %vm266_vm1, %v217_v2  ;;  %v250_v7 = vld [vmem:[%s1518_s23 + $0x188] sm:$0xff]  ;;  %v251_v11 = vld [vmem:[%s1518_s23 + $0x190] sm:$0xff] }
  0x11   : > { %v249_v4 = vld [vmem:[%s1518_s23 + $0x180] sm:$0xff]  ;;  %1419 = vmatmul.msk.f32.vlgmr.msra.gmra.mxu2 %vm266_vm1, %v233_v3  ;;  %v234_v8 = vld [vmem:[%s1518_s23 + $0x108] sm:$0xff]  ;;  %v235_v12 = vld [vmem:[%s1518_s23 + $0x110] sm:$0xff] }
  0x12   : > { %1435 = vmatmul.msk.f32.vlgmr.msra.gmra.mxu3 %vm266_vm1, %v249_v4  ;;  %v220_v13 = vld [vmem:[%s1518_s23 + $0x98] sm:$0xff]  ;;  %v205_v17 = vld [vmem:[%s1518_s23 + $0x20] sm:$0xff]  ;;  %v206_v21 = vld [vmem:[%s1518_s23 + $0x28] sm:$0xff] }
  0x13   : > { %v204_v14 = vld [vmem:[%s1518_s23 + $0x18] sm:$0xff]  ;;  %v221_v18 = vld [vmem:[%s1518_s23 + $0xa0] sm:$0xff]  ;;  %v222_v22 = vld [vmem:[%s1518_s23 + $0xa8] sm:$0xff] }
  0x14   : > { %v236_v15 = vld [vmem:[%s1518_s23 + $0x118] sm:$0xff]  ;;  %v253_v19 = vld [vmem:[%s1518_s23 + $0x1a0] sm:$0xff]  ;;  %v238_v23 = vld [vmem:[%s1518_s23 + $0x128] sm:$0xff] }
  0x15   : > { %v252_v16 = vld [vmem:[%s1518_s23 + $0x198] sm:$0xff]  ;;  %v237_v20 = vld [vmem:[%s1518_s23 + $0x120] sm:$0xff]  ;;  %v254_v24 = vld [vmem:[%s1518_s23 + $0x1a8] sm:$0xff] }
  0x16   : > { %v223_v25 = vld [vmem:[%s1518_s23 + $0xb0] sm:$0xff]  ;;  %v208_v29 = vld [vmem:[%s1518_s23 + $0x38] sm:$0xff]  ;;  %v209_v33 = vld [vmem:[%s1518_s23 + $0x40] sm:$0xff] }
  0x17   : > { %1388 = vmatmul.msk.f32.gmra.mxu0 %vm266_vm1, %v202_v6  ;;  %v207_v26 = vld [vmem:[%s1518_s23 + $0x30] sm:$0xff]  ;;  %v224_v30 = vld [vmem:[%s1518_s23 + $0xb8] sm:$0xff]  ;;  %v225_v34 = vld [vmem:[%s1518_s23 + $0xc0] sm:$0xff] }
  0x18   : > { %1404 = vmatmul.msk.f32.gmra.mxu1 %vm266_vm1, %v218_v5  ;;  %v239_v27 = vld [vmem:[%s1518_s23 + $0x130] sm:$0xff]  ;;  %v256_v31 = vld [vmem:[%s1518_s23 + $0x1b8] sm:$0xff]  ;;  %v241_v35 = vld [vmem:[%s1518_s23 + $0x140] sm:$0xff] }
  0x19   : > { %1420 = vmatmul.msk.f32.gmra.mxu2 %vm266_vm1, %v234_v8  ;;  %v255_v28 = vld [vmem:[%s1518_s23 + $0x1b0] sm:$0xff]  ;;  %v240_v32 = vld [vmem:[%s1518_s23 + $0x138] sm:$0xff]  ;;  %v257_v36 = vld [vmem:[%s1518_s23 + $0x1c0] sm:$0xff] }
  0x1a   : > { %1436 = vmatmul.msk.f32.gmra.mxu3 %vm266_vm1, %v250_v7  ;;  %v226_v37 = vld [vmem:[%s1518_s23 + $0xc8] sm:$0xff]  ;;  %v211_v51 = vld [vmem:[%s1518_s23 + $0x50] sm:$0xff] }
  0x1b   : > { %v242_v38 = vld [vmem:[%s1518_s23 + $0x148] sm:$0xff]  ;;  %v227_v52 = vld [vmem:[%s1518_s23 + $0xd0] sm:$0xff] }
  0x1c   : > { %v210_v40 = vld [vmem:[%s1518_s23 + $0x48] sm:$0xff]  ;;  %v259_v53 = vld [vmem:[%s1518_s23 + $0x1d0] sm:$0xff] }
  0x1d   : > { %v258_v41 = vld [vmem:[%s1518_s23 + $0x1c8] sm:$0xff]  ;;  %v243_v63 = vld [vmem:[%s1518_s23 + $0x150] sm:$0xff] }
  0x1f   : > { %1389 = vmatmul.msk.f32.gmra.mxu0 %vm266_vm1, %v203_v9  ;;  %v212_v9 = vld [vmem:[%s1518_s23 + $0x58] sm:$0xff] }
  0x20   : > { %1405 = vmatmul.msk.f32.gmra.mxu1 %vm266_vm1, %v219_v10  ;;  %v228_v10 = vld [vmem:[%s1518_s23 + $0xd8] sm:$0xff] }
  0x21   : > { %1421 = vmatmul.msk.f32.gmra.mxu2 %vm266_vm1, %v235_v12  ;;  %v260_v12 = vld [vmem:[%s1518_s23 + $0x1d8] sm:$0xff] }
  0x22   : > { %1437 = vmatmul.msk.f32.gmra.mxu3 %vm266_vm1, %v251_v11  ;;  %v244_v11 = vld [vmem:[%s1518_s23 + $0x158] sm:$0xff] }
  0x27   : > { %1390 = vmatmul.msk.f32.gmra.mxu0 %vm266_vm1, %v204_v14 }
  0x28   : > { %1406 = vmatmul.msk.f32.gmra.mxu1 %vm266_vm1, %v220_v13 }
  0x29   : > { %1422 = vmatmul.msk.f32.gmra.mxu2 %vm266_vm1, %v236_v15 }
  0x2a   : > { %1438 = vmatmul.msk.f32.gmra.mxu3 %vm266_vm1, %v252_v16 }
  0x2f   : > { %1391 = vmatmul.msk.f32.gmra.mxu0 %vm266_vm1, %v205_v17 }
  0x30   : > { %1407 = vmatmul.msk.f32.gmra.mxu1 %vm266_vm1, %v221_v18 }
  0x31   : > { %1423 = vmatmul.msk.f32.gmra.mxu2 %vm266_vm1, %v237_v20 }
  0x32   : > { %1439 = vmatmul.msk.f32.gmra.mxu3 %vm266_vm1, %v253_v19 }
  0x37   : > { %1392 = vmatmul.msk.f32.gmra.mxu0 %vm266_vm1, %v206_v21 }
  0x38   : > { %1408 = vmatmul.msk.f32.gmra.mxu1 %vm266_vm1, %v222_v22 }
  0x39   : > { %1424 = vmatmul.msk.f32.gmra.mxu2 %vm266_vm1, %v238_v23 }
  0x3a   : > { %1440 = vmatmul.msk.f32.gmra.mxu3 %vm266_vm1, %v254_v24 }
  0x3f   : > { %1393 = vmatmul.msk.f32.gmra.mxu0 %vm266_vm1, %v207_v26 }
  0x40   : > { %1409 = vmatmul.msk.f32.gmra.mxu1 %vm266_vm1, %v223_v25 }
  0x41   : > { %1425 = vmatmul.msk.f32.gmra.mxu2 %vm266_vm1, %v239_v27  ;;  %v229_v27 = vld [vmem:[%s1518_s23 + $0xe0] sm:$0xff] }
  0x42   : > { %1441 = vmatmul.msk.f32.gmra.mxu3 %vm266_vm1, %v255_v28  ;;  %v245_v28 = vld [vmem:[%s1518_s23 + $0x160] sm:$0xff] }
  0x47   : > { %1394 = vmatmul.msk.f32.gmra.mxu0 %vm266_vm1, %v208_v29 }
  0x48   : > { %1410 = vmatmul.msk.f32.gmra.mxu1 %vm266_vm1, %v224_v30 }
  0x49   : > { %1426 = vmatmul.msk.f32.gmra.mxu2 %vm266_vm1, %v240_v32 }
  0x4a   : > { %1442 = vmatmul.msk.f32.gmra.mxu3 %vm266_vm1, %v256_v31 }
  0x4f   : > { %1395 = vmatmul.msk.f32.gmra.mxu0 %vm266_vm1, %v209_v33 }
  0x50   : > { %1411 = vmatmul.msk.f32.gmra.mxu1 %vm266_vm1, %v225_v34  ;;  %v213_v34 = vld [vmem:[%s1518_s23 + $0x60] sm:$0xff] }
  0x51   : > { %1427 = vmatmul.msk.f32.gmra.mxu2 %vm266_vm1, %v241_v35  ;;  %v261_v35 = vld [vmem:[%s1518_s23 + $0x1e0] sm:$0xff] }
  0x52   : > { %1443 = vmatmul.msk.f32.gmra.mxu3 %vm266_vm1, %v257_v36 }
  0x57   : > { %1396 = vmatmul.msk.f32.gmra.mxu0 %vm266_vm1, %v210_v40 }
  0x58   : > { %1412 = vmatmul.msk.f32.gmra.mxu1 %vm266_vm1, %v226_v37 }
  0x59   : > { %1428 = vmatmul.msk.f32.gmra.mxu2 %vm266_vm1, %v242_v38 }
  0x5a   : > { %1444 = vmatmul.msk.f32.gmra.mxu3 %vm266_vm1, %v258_v41 }
  0x5f   : > { %1397 = vmatmul.msk.f32.gmra.mxu0 %vm266_vm1, %v211_v51 }
  0x60   : > { %1413 = vmatmul.msk.f32.gmra.mxu1 %vm266_vm1, %v227_v52 }
  0x61   : > { %1429 = vmatmul.msk.f32.gmra.mxu2 %vm266_vm1, %v243_v63  ;;  %v215_v63 = vld [vmem:[%s1518_s23 + $0x70] sm:$0xff] }
  0x62   : > { %1445 = vmatmul.msk.f32.gmra.mxu3 %vm266_vm1, %v259_v53 }
  0x67   : > { %1398 = vmatmul.msk.f32.gmra.mxu0 %vm266_vm1, %v212_v9 }
  0x68   : > { %1414 = vmatmul.msk.f32.gmra.mxu1 %vm266_vm1, %v228_v10 }
  0x69   : > { %1430 = vmatmul.msk.f32.gmra.mxu2 %vm266_vm1, %v244_v11 }
  0x6a   : > { %1446 = vmatmul.msk.f32.gmra.mxu3 %vm266_vm1, %v260_v12 }
  0x6f   : > { %1399 = vmatmul.msk.f32.gmra.mxu0 %vm266_vm1, %v213_v34  ;;  %v248_v34 = vld [vmem:[%s1518_s23 + $0x178] sm:$0xff] }
  0x70   : > { %1415 = vmatmul.msk.f32.gmra.mxu1 %vm266_vm1, %v229_v27 }
  0x71   : > { %1431 = vmatmul.msk.f32.gmra.mxu2 %vm266_vm1, %v245_v28 }
  0x72   : > { %1447 = vmatmul.msk.f32.gmra.mxu3 %vm266_vm1, %v261_v35  ;;  %v264_v35 = vld [vmem:[%s1518_s23 + $0x1f8] sm:$0xff] }
  0x8c   : > { %v480_v44 = vpop.f32.mrf.mxu0 }
  0x8d   : > { %v528_v45 = vpop.f32.mrf.mxu1  ;;  %v672_v46 = vmax.f32 %v480_v44, 0.0 }
  0x8e   : > { %v688_v47 = vmax.f32 %v528_v45, 0.0  ;;  %v214_v45 = vld [vmem:[%s1518_s23 + $0x68] sm:$0xff] }
  0x8f   : > { %v738_v50 = vmul.f32 %v1603_v43, %v672_v46  ;;  %v931_v61 = vmul.f32 %v1601_v42, %v672_v46  ;;  %v230_v46 = vld [vmem:[%s1518_s23 + $0xe8] sm:$0xff]  ;;  %1400 = vmatmul.msk.f32.gmra.mxu0 %vm266_vm1, %v214_v45 }
  0x90   : > { %v947_v48 = vmul.f32 %v1601_v42, %v688_v47  ;;  %v754_v49 = vmul.f32 %v1603_v43, %v688_v47  ;;  %v262_v47 = vld [vmem:[%s1518_s23 + $0x1e8] sm:$0xff]  ;;  %1416 = vmatmul.msk.f32.gmra.mxu1 %vm266_vm1, %v230_v46 }
  0x91   : > { %802 = vadd.xlane.f32.xlu0 %v738_v50  ;;  %1448 = vmatmul.msk.f32.gmra.mxu3 %vm266_vm1, %v262_v47 }
  0x92   : > { %1027 = vadd.xlane.f32.xlu2 %v947_v48  ;;  %834 = vadd.xlane.f32.xlu1 %v754_v49 }
  0x94   : > { %v576_v54 = vpop.f32.mrf.mxu2  ;;  %v483_v2 = vpop.f32.mrf.mxu0 }
  0x95   : > { %v1613_v55 = vpop.f32.mrf.mxu3  ;;  %v704_v56 = vmax.f32 %v576_v54, 0.0  ;;  %v531_v60 = vpop.f32.mrf.mxu1  ;;  %v673_v7 = vmax.f32 %v483_v2, 0.0  ;;  %v231_v2 = vld [vmem:[%s1518_s23 + $0xf0] sm:$0xff] }
  0x96   : > { %v2330_v57 = vmax.f32 %v1613_v55, 0.0  ;;  %v689_v62 = vmax.f32 %v531_v60, 0.0 }
  0x97   : > { %v770_v58 = vmul.f32 %v1603_v43, %v704_v56  ;;  %v963_v5 = vmul.f32 %v1601_v42, %v704_v56  ;;  %v932_v14 = vmul.f32 %v1601_v42, %v673_v7  ;;  %v739_v15 = vmul.f32 %v1603_v43, %v673_v7  ;;  %v246_v56 = vld [vmem:[%s1518_s23 + $0x168] sm:$0xff]  ;;  %1401 = vmatmul.msk.f32.gmra.mxu0 %vm266_vm1, %v215_v63 }
  0x98   : > { %v786_v59 = vmul.f32 %v1603_v43, %v2330_v57  ;;  %v755_v3 = vmul.f32 %v1603_v43, %v689_v62  ;;  %v948_v24 = vmul.f32 %v1601_v42, %v689_v62  ;;  %1432 = vmatmul.msk.f32.gmra.mxu2 %vm266_vm1, %v246_v56  ;;  %1417 = vmatmul.msk.f32.gmra.mxu1 %vm266_vm1, %v231_v2 }
  0x9a   : > { %866 = vadd.xlane.f32.xlu2 %v770_v58  ;;  %995 = vadd.xlane.f32.xlu1 %v931_v61 }
  0x9b   : > { %898 = vadd.xlane.f32.xlu0 %v786_v59 }
  0x9c   : > { %v579_v6 = vpop.f32.mrf.mxu2  ;;  %v486_v16 = vpop.f32.mrf.mxu0 }
  0x9d   : > { %v1625_v0 = vpop.f32.mrf.mxu3  ;;  %v705_v8 = vmax.f32 %v579_v6, 0.0  ;;  %v674_v18 = vmax.f32 %v486_v16, 0.0  ;;  %v534_v20 = vpop.f32.mrf.mxu1 }
  0x9e   : > { %v2331_v1 = vmax.f32 %v1625_v0, 0.0  ;;  %v690_v25 = vmax.f32 %v534_v20, 0.0 }
  0x9f   : > { %v964_v13 = vmul.f32 %v1601_v42, %v705_v8  ;;  %v740_v22 = vmul.f32 %v1603_v43, %v674_v18  ;;  %v771_v32 = vmul.f32 %v1603_v43, %v705_v8  ;;  %v933_v52 = vmul.f32 %v1601_v42, %v674_v18 }
  0xa0   : > { %v787_v4 = vmul.f32 %v1603_v43, %v2331_v1  ;;  %v949_v30 = vmul.f32 %v1601_v42, %v690_v25  ;;  %v756_v40 = vmul.f32 %v1603_v43, %v690_v25 }
  0xa2   : > { %836 = vadd.xlane.f32.xlu2 %v755_v3  ;;  %900 = vadd.xlane.f32.xlu1 %v787_v4  ;;  %v247_v3 = vld [vmem:[%s1518_s23 + $0x170] sm:$0xff] }
  0xa3   : > { %1059 = vadd.xlane.f32.xlu0 %v963_v5  ;;  %v263_v4 = vld [vmem:[%s1518_s23 + $0x1f0] sm:$0xff]  ;;  %1433 = vmatmul.msk.f32.gmra.mxu2 %vm266_vm1, %v247_v3 }
  0xa4   : > { %v582_v23 = vpop.f32.mrf.mxu2  ;;  %v489_v36 = vpop.f32.mrf.mxu0  ;;  %1449 = vmatmul.msk.f32.gmra.mxu3 %vm266_vm1, %v263_v4 }
  0xa5   : > { %v1645_v17 = vpop.f32.mrf.mxu3  ;;  %v706_v26 = vmax.f32 %v582_v23, 0.0  ;;  %v537_v31 = vpop.f32.mrf.mxu1  ;;  %v675_v41 = vmax.f32 %v489_v36, 0.0 }
  0xa6   : > { %v2326_v19 = vmax.f32 %v1645_v17, 0.0  ;;  %v691_v33 = vmax.f32 %v537_v31, 0.0 }
  0xa7   : > { %v965_v29 = vmul.f32 %v1601_v42, %v706_v26  ;;  %v772_v38 = vmul.f32 %v1603_v43, %v706_v26  ;;  %v741_v49 = vmul.f32 %v1603_v43, %v675_v41  ;;  %v934_v7 = vmul.f32 %v1601_v42, %v675_v41  ;;  %v232_v26 = vld [vmem:[%s1518_s23 + $0xf8] sm:$0xff] }
  0xa8   : > { %v788_v21 = vmul.f32 %v1603_v43, %v2326_v19  ;;  %v950_v37 = vmul.f32 %v1601_v42, %v691_v33  ;;  %v757_v61 = vmul.f32 %v1603_v43, %v691_v33  ;;  %1418 = vmatmul.msk.f32.gmra.mxu1 %vm266_vm1, %v232_v26 }
  0xaa   : > { %1061 = vadd.xlane.f32.xlu1 %v964_v13  ;;  %997 = vadd.xlane.f32.xlu2 %v932_v14 }
  0xab   : > { %804 = vadd.xlane.f32.xlu0 %v739_v15  ;;  %1434 = vmatmul.msk.f32.gmra.mxu2 %vm266_vm1, %v248_v34 }
  0xac   : > { %v585_v39 = vpop.f32.mrf.mxu2  ;;  %v492_v50 = vpop.f32.mrf.mxu0  ;;  %1450 = vmatmul.msk.f32.gmra.mxu3 %vm266_vm1, %v264_v35 }
  0xad   : > { %v707_v44 = vmax.f32 %v585_v39, 0.0  ;;  %v1675_v51 = vpop.f32.mrf.mxu3  ;;  %v676_v53 = vmax.f32 %v492_v50, 0.0  ;;  %v540_v60 = vpop.f32.mrf.mxu1 }
  0xae   : > { %v2328_v54 = vmax.f32 %v1675_v51, 0.0  ;;  %v692_v62 = vmax.f32 %v540_v60, 0.0 }
  0xaf   : > { %v773_v48 = vmul.f32 %v1603_v43, %v707_v44  ;;  %v742_v58 = vmul.f32 %v1603_v43, %v676_v53  ;;  %v966_v8 = vmul.f32 %v1601_v42, %v707_v44  ;;  %v935_v15 = vmul.f32 %v1601_v42, %v676_v53 }
  0xb0   : > { %v789_v59 = vmul.f32 %v1603_v43, %v2328_v54  ;;  %v758_v5 = vmul.f32 %v1603_v43, %v692_v62  ;;  %v951_v12 = vmul.f32 %v1601_v42, %v692_v62 }
  0xb2   : > { %902 = vadd.xlane.f32.xlu2 %v788_v21  ;;  %806 = vadd.xlane.f32.xlu1 %v740_v22 }
  0xb3   : > { %1029 = vadd.xlane.f32.xlu0 %v948_v24 }
  0xb4   : > { %v1700_v10 = vpop.f32.mrf.mxu2  ;;  %v495_v13 = vpop.f32.mrf.mxu0 }
  0xb5   : > { %v1695_v6 = vpop.f32.mrf.mxu3  ;;  %v543_v14 = vpop.f32.mrf.mxu1  ;;  %v677_v16 = vmax.f32 %v495_v13, 0.0  ;;  %v708_v20 = vmax.f32 %v1700_v10, 0.0 }
  0xb6   : > { %v2329_v9 = vmax.f32 %v1695_v6, 0.0  ;;  %v693_v18 = vmax.f32 %v543_v14, 0.0 }
  0xb7   : > { %v743_v22 = vmul.f32 %v1603_v43, %v677_v16  ;;  %v774_v23 = vmul.f32 %v1603_v43, %v708_v20  ;;  %v936_v41 = vmul.f32 %v1601_v42, %v677_v16 }
  0xb8   : > { %v790_v11 = vmul.f32 %v1603_v43, %v2329_v9  ;;  %v952_v21 = vmul.f32 %v1601_v42, %v693_v18  ;;  %v759_v33 = vmul.f32 %v1603_v43, %v693_v18 }
  0xba   : > { %1063 = vadd.xlane.f32.xlu2 %v965_v29  ;;  %1031 = vadd.xlane.f32.xlu1 %v949_v30 }
  0xbb   : > { %868 = vadd.xlane.f32.xlu0 %v771_v32  ;;  %v216_v32 = vld [vmem:[%s1518_s23 + $0x78] sm:$0xff] }
  0xbc   : > { %v1713_v24 = vpop.f32.mrf.mxu2  ;;  %1402 = vmatmul.msk.f32.gmra.mxu0 %vm266_vm1, %v216_v32 }
  0xbd   : > { %v1715_v25 = vpop.f32.mrf.mxu3  ;;  %v709_v27 = vmax.f32 %v1713_v24, 0.0  ;;  %v546_v31 = vpop.f32.mrf.mxu1 }
  0xbe   : > { %v2322_v28 = vmax.f32 %v1715_v25, 0.0  ;;  %v694_v36 = vmax.f32 %v546_v31, 0.0 }
  0xbf   : > { %v775_v29 = vmul.f32 %v1603_v43, %v709_v27 }
  0xc0   : > { %v791_v30 = vmul.f32 %v1603_v43, %v2322_v28  ;;  %v953_v39 = vmul.f32 %v1601_v42, %v694_v36 }
  0xc2   : > { %1033 = vadd.xlane.f32.xlu2 %v950_v37  ;;  %870 = vadd.xlane.f32.xlu1 %v772_v38  ;;  %v498_v37 = vpop.f32.mrf.mxu0  ;;  %v760_v38 = vmul.f32 %v1603_v43, %v694_v36 }
  0xc3   : > { %838 = vadd.xlane.f32.xlu0 %v756_v40  ;;  %v678_v44 = vmax.f32 %v498_v37, 0.0 }
  0xc4   : > { %v1736_v40 = vpop.f32.mrf.mxu2 }
  0xc5   : > { %v710_v45 = vmax.f32 %v1736_v40, 0.0  ;;  %v1740_v46 = vpop.f32.mrf.mxu3  ;;  %v549_v50 = vpop.f32.mrf.mxu1 }
  0xc6   : > { %v695_v53 = vmax.f32 %v549_v50, 0.0 }
  0xc7   : > { %v776_v47 = vmul.f32 %v1603_v43, %v710_v45 }
  0xc8   : > { %v761_v2 = vmul.f32 %v1603_v43, %v695_v53 }
  0xca   : > { %872 = vadd.xlane.f32.xlu2 %v773_v48  ;;  %808 = vadd.xlane.f32.xlu1 %v741_v49  ;;  %v937_v48 = vmul.f32 %v1601_v42, %v678_v44  ;;  %v744_v49 = vmul.f32 %v1603_v43, %v678_v44 }
  0xcb   : > { %999 = vadd.xlane.f32.xlu0 %v933_v52  ;;  %v501_v52 = vpop.f32.mrf.mxu0 }
  0xcc   : > { %v679_v56 = vmax.f32 %v501_v52, 0.0 }
  0xce   : > { %v745_v3 = vmul.f32 %v1603_v43, %v679_v56  ;;  %v938_v26 = vmul.f32 %v1601_v42, %v679_v56 }
  0xd2   : > { %840 = vadd.xlane.f32.xlu1 %v757_v61  ;;  %810 = vadd.xlane.f32.xlu2 %v742_v58  ;;  %v2324_v58 = vmax.f32 %v1740_v46, 0.0 }
  0xd3   : > { %904 = vadd.xlane.f32.xlu0 %v789_v59  ;;  %v1751_v59 = vld [vmem:[%s2316_s3] ss:$0 sm:$0xff] }
  0xda   : > { %1001 = vadd.xlane.f32.xlu1 %v934_v7  ;;  %842 = vadd.xlane.f32.xlu2 %v758_v5  ;;  %v792_v5 = vmul.f32 %v1603_v43, %v2324_v58  ;;  %v1767_v7 = vpop.f32.mrf.mxu3 }
  0xdb   : > { %1065 = vadd.xlane.f32.xlu0 %v966_v8  ;;  %v2325_v8 = vmax.f32 %v1767_v7, 0.0 }
  0xdd   : > { %v793_v16 = vmul.f32 %v1603_v43, %v2325_v8 }
  0xe2   : > { %906 = vadd.xlane.f32.xlu1 %v790_v11  ;;  %1003 = vadd.xlane.f32.xlu2 %v935_v15  ;;  %v1772_v11 = vpop.f32.mrf.mxu2 }
  0xe3   : > { %1035 = vadd.xlane.f32.xlu0 %v951_v12  ;;  %v711_v31 = vmax.f32 %v1772_v11, 0.0 }
  0xea   : > { %1037 = vadd.xlane.f32.xlu1 %v952_v21  ;;  %812 = vadd.xlane.f32.xlu2 %v743_v22  ;;  %v954_v21 = vmul.f32 %v1601_v42, %v695_v53  ;;  %v552_v22 = vpop.f32.mrf.mxu1 }
  0xeb   : > { %874 = vadd.xlane.f32.xlu0 %v774_v23  ;;  %v504_v23 = vpop.f32.mrf.mxu0 }
  0xf2   : > { %876 = vadd.xlane.f32.xlu1 %v775_v29  ;;  %908 = vadd.xlane.f32.xlu2 %v791_v30  ;;  %v696_v29 = vmax.f32 %v552_v22, 0.0  ;;  %v680_v30 = vmax.f32 %v504_v23, 0.0 }
  0xf3   : > { %844 = vadd.xlane.f32.xlu0 %v759_v33 }
  0xf4   : > { %v955_v35 = vmul.f32 %v1601_v42, %v696_v29  ;;  %v746_v36 = vmul.f32 %v1603_v43, %v680_v30  ;;  %v939_v22 = vmul.f32 %v1601_v42, %v680_v30 }
  0xfa   : > { %846 = vadd.xlane.f32.xlu1 %v760_v38  ;;  %1039 = vadd.xlane.f32.xlu2 %v953_v39  ;;  %v777_v38 = vmul.f32 %v1603_v43, %v711_v31  ;;  %v1794_v39 = vpop.f32.mrf.mxu2 }
  0xfb   : > { %1005 = vadd.xlane.f32.xlu0 %v936_v41  ;;  %v1796_v41 = vpop.f32.mrf.mxu3 }
 0x102   : > { %878 = vadd.xlane.f32.xlu2 %v776_v47  ;;  %1007 = vadd.xlane.f32.xlu1 %v937_v48  ;;  %v712_v47 = vmax.f32 %v1794_v39, 0.0  ;;  %v2319_v48 = vmax.f32 %v1796_v41, 0.0 }
 0x103   : > { %814 = vadd.xlane.f32.xlu0 %v744_v49 }
 0x104   : > { %v803_v63 = vpop.xlane.xlu0 %802  ;;  %v778_v53 = vmul.f32 %v1603_v43, %v712_v47  ;;  %v794_v56 = vmul.f32 %v1603_v43, %v2319_v48  ;;  %v971_v10 = vmul.f32 %v1601_v42, %v712_v47 }
 0x105   : > { %v1028_v60 = vpop.xlane.xlu2 %1027  ;;  %v835_v61 = vpop.xlane.xlu1 %834 }
 0x106   : > { %v1140_v62 = vsel %vm1123_vm2, %v835_v61, %v1028_v60  ;;  %v555_v61 = vpop.f32.mrf.mxu1 }
 0x107   : > { %v1208_v4 = vadd.f32 %v1751_v59, %v1140_v62 }
 0x109   : > { %1273 = vst.msk [vmem:[%s1758_s30 + $0x80] sm:$0xff] %vm1256_vm3, %v1208_v4 }
 0x10a   : > { %848 = vadd.xlane.f32.xlu2 %v761_v2  ;;  %816 = vadd.xlane.f32.xlu1 %v745_v3  ;;  %v697_v2 = vmax.f32 %v555_v61, 0.0  ;;  %v507_v3 = vpop.f32.mrf.mxu0 }
 0x10b   : > { %910 = vadd.xlane.f32.xlu0 %v792_v5 }
 0x10d   : > { %v867_v12 = vpop.xlane.xlu2 %866  ;;  %v996_v13 = vpop.xlane.xlu1 %995 }
 0x10e   : > { %v1124_v14 = vsel %vm1123_vm2, %v803_v63, %v996_v13  ;;  %v1775_v15 = vpop.xlane.xlu0 %898  ;;  %v762_v63 = vmul.f32 %v1603_v43, %v696_v29  ;;  %v763_v13 = vmul.f32 %v1603_v43, %v697_v2  ;;  %v1826_v29 = vpop.f32.mrf.mxu3 }
 0x10f   : > { %v1192_v18 = vadd.f32 %v1751_v59, %v1124_v14  ;;  %v956_v14 = vmul.f32 %v1601_v42, %v697_v2 }
 0x111   : > { %1257 = vst.msk [vmem:[%s1758_s30] sm:$0xff] %vm1256_vm3, %v1192_v18  ;;  %v1819_v18 = vpop.f32.mrf.mxu2 }
 0x112   : > { %1009 = vadd.xlane.f32.xlu2 %v938_v26  ;;  %912 = vadd.xlane.f32.xlu1 %v793_v16  ;;  %v713_v23 = vmax.f32 %v1819_v18, 0.0  ;;  %v681_v26 = vmax.f32 %v507_v3, 0.0 }
 0x113   : > { %1041 = vadd.xlane.f32.xlu0 %v954_v21 }
 0x114   : > { %v940_v30 = vmul.f32 %v1601_v42, %v681_v26 }
 0x115   : > { %v837_v32 = vpop.xlane.xlu2 %836  ;;  %v1786_v33 = vpop.xlane.xlu1 %900 }
 0x116   : > { %v1060_v34 = vpop.xlane.xlu0 %1059 }
 0x117   : > { %v1156_v37 = vsel %vm1123_vm2, %v867_v12, %v1060_v34 }
 0x118   : > { %v1224_v44 = vadd.f32 %v1751_v59, %v1156_v37 }
 0x11a   : > { %1289 = vst.msk [vmem:[%s1758_s30 + $0x100] sm:$0xff] %vm1256_vm3, %v1224_v44  ;;  %1043 = vadd.xlane.f32.xlu1 %v955_v35  ;;  %818 = vadd.xlane.f32.xlu2 %v746_v36  ;;  %v779_v36 = vmul.f32 %v1603_v43, %v713_v23  ;;  %v558_v44 = vpop.f32.mrf.mxu1 }
 0x11b   : > { %880 = vadd.xlane.f32.xlu0 %v777_v38  ;;  %v747_v38 = vmul.f32 %v1603_v43, %v681_v26  ;;  %v1854_v26 = vpop.f32.mrf.mxu2 }
 0x11d   : > { %v1062_v49 = vpop.xlane.xlu1 %1061  ;;  %v998_v50 = vpop.xlane.xlu2 %997 }
 0x11e   : > { %v805_v52 = vpop.xlane.xlu0 %804 }
 0x11f   : > { %v1125_v60 = vsel %vm1123_vm2, %v805_v52, %v998_v50  ;;  %v510_v50 = vpop.f32.mrf.mxu0 }
 0x120   : > { %v1193_v62 = vadd.f32 %v1751_v59, %v1125_v60  ;;  %v2320_v60 = vmax.f32 %v1826_v29, 0.0 }
 0x122   : > { %1258 = vst.msk [vmem:[%s1758_s30 + $0x8] sm:$0xff] %vm1256_vm3, %v1193_v62  ;;  %882 = vadd.xlane.f32.xlu1 %v778_v53  ;;  %914 = vadd.xlane.f32.xlu2 %v794_v56  ;;  %v698_v53 = vmax.f32 %v558_v44, 0.0  ;;  %v682_v56 = vmax.f32 %v510_v50, 0.0 }
 0x123   : > { %850 = vadd.xlane.f32.xlu0 %v762_v63 }
 0x124   : > { %v764_v2 = vmul.f32 %v1603_v43, %v698_v53  ;;  %v748_v3 = vmul.f32 %v1603_v43, %v682_v56 }
 0x125   : > { %v1814_v4 = vpop.xlane.xlu2 %902  ;;  %v807_v5 = vpop.xlane.xlu1 %806 }
 0x126   : > { %v1030_v12 = vpop.xlane.xlu0 %1029 }
 0x127   : > { %v1141_v16 = vsel %vm1123_vm2, %v837_v32, %v1030_v12  ;;  %v513_v44 = vpop.f32.mrf.mxu0 }
 0x128   : > { %v1209_v21 = vadd.f32 %v1751_v59, %v1141_v16  ;;  %v1846_v16 = vpop.f32.mrf.mxu3 }
 0x12a   : > { %1274 = vst.msk [vmem:[%s1758_s30 + $0x88] sm:$0xff] %vm1256_vm3, %v1209_v21  ;;  %852 = vadd.xlane.f32.xlu1 %v763_v13  ;;  %1045 = vadd.xlane.f32.xlu2 %v956_v14  ;;  %v795_v14 = vmul.f32 %v1603_v43, %v2320_v60 }
 0x12b   : > { %1011 = vadd.xlane.f32.xlu0 %v939_v22  ;;  %v2321_v22 = vmax.f32 %v1846_v16, 0.0 }
 0x12d   : > { %v1064_v34 = vpop.xlane.xlu2 %1063  ;;  %v1032_v35 = vpop.xlane.xlu1 %1031 }
 0x12e   : > { %v869_v32 = vpop.xlane.xlu0 %868 }
 0x12f   : > { %v1157_v37 = vsel %vm1123_vm2, %v869_v32, %v1062_v49 }
 0x130   : > { %v1225_v52 = vadd.f32 %v1751_v59, %v1157_v37  ;;  %v957_v37 = vmul.f32 %v1601_v42, %v698_v53 }
 0x132   : > { %1290 = vst.msk [vmem:[%s1758_s30 + $0x108] sm:$0xff] %vm1256_vm3, %v1225_v52  ;;  %884 = vadd.xlane.f32.xlu2 %v779_v36  ;;  %1013 = vadd.xlane.f32.xlu1 %v940_v30  ;;  %v796_v36 = vmul.f32 %v1603_v43, %v2321_v22  ;;  %v941_v52 = vmul.f32 %v1601_v42, %v682_v56 }
 0x133   : > { %820 = vadd.xlane.f32.xlu0 %v747_v38  ;;  %v561_v38 = vpop.f32.mrf.mxu1 }
 0x135   : > { %v1034_v61 = vpop.xlane.xlu2 %1033  ;;  %v871_v62 = vpop.xlane.xlu1 %870 }
 0x136   : > { %v839_v49 = vpop.xlane.xlu0 %838  ;;  %v1158_v63 = vsel %vm1123_vm2, %v871_v62, %v1064_v34  ;;  %v699_v62 = vmax.f32 %v561_v38, 0.0 }
 0x137   : > { %v1142_v12 = vsel %vm1123_vm2, %v839_v49, %v1032_v35  ;;  %v1226_v13 = vadd.f32 %v1751_v59, %v1158_v63  ;;  %v683_v49 = vmax.f32 %v513_v44, 0.0  ;;  %v714_v63 = vmax.f32 %v1854_v26, 0.0 }
 0x138   : > { %v1210_v21 = vadd.f32 %v1751_v59, %v1142_v12  ;;  %v958_v12 = vmul.f32 %v1601_v42, %v699_v62 }
 0x139   : > { %1291 = vst.msk [vmem:[%s1758_s30 + $0x110] sm:$0xff] %vm1256_vm3, %v1226_v13  ;;  %v749_v56 = vmul.f32 %v1603_v43, %v683_v49  ;;  %v973_v40 = vmul.f32 %v1601_v42, %v714_v63 }
 0x13a   : > { %1275 = vst.msk [vmem:[%s1758_s30 + $0x90] sm:$0xff] %vm1256_vm3, %v1210_v21  ;;  %854 = vadd.xlane.f32.xlu2 %v764_v2  ;;  %822 = vadd.xlane.f32.xlu1 %v748_v3  ;;  %v1875_v21 = vpop.f32.mrf.mxu2 }
 0x13b   : > { %916 = vadd.xlane.f32.xlu0 %v795_v14  ;;  %v780_v14 = vmul.f32 %v1603_v43, %v714_v63 }
 0x13d   : > { %v873_v34 = vpop.xlane.xlu2 %872  ;;  %v809_v35 = vpop.xlane.xlu1 %808 }
 0x13e   : > { %v1000_v32 = vpop.xlane.xlu0 %999 }
 0x13f   : > { %v1126_v30 = vsel %vm1123_vm2, %v807_v5, %v1000_v32  ;;  %v1877_v32 = vpop.f32.mrf.mxu3 }
 0x140   : > { %v1194_v50 = vadd.f32 %v1751_v59, %v1126_v30 }
 0x142   : > { %1259 = vst.msk [vmem:[%s1758_s30 + $0x10] sm:$0xff] %vm1256_vm3, %v1194_v50  ;;  %1015 = vadd.xlane.f32.xlu2 %v941_v52  ;;  %918 = vadd.xlane.f32.xlu1 %v796_v36  ;;  %v2318_v36 = vmax.f32 %v1877_v32, 0.0 }
 0x143   : > { %1047 = vadd.xlane.f32.xlu0 %v957_v37 }
 0x144   : > { %v797_v52 = vmul.f32 %v1603_v43, %v2318_v36 }
 0x145   : > { %v841_v2 = vpop.xlane.xlu1 %840  ;;  %v811_v5 = vpop.xlane.xlu2 %810 }
 0x146   : > { %v1866_v3 = vpop.xlane.xlu0 %904  ;;  %v1143_v53 = vsel %vm1123_vm2, %v841_v2, %v1034_v61  ;;  %v715_v61 = vmax.f32 %v1875_v21, 0.0 }
 0x147   : > { %v1211_v13 = vadd.f32 %v1751_v59, %v1143_v53 }
 0x148   : > { %v781_v50 = vmul.f32 %v1603_v43, %v715_v61 }
 0x149   : > { %1276 = vst.msk [vmem:[%s1758_s30 + $0x98] sm:$0xff] %vm1256_vm3, %v1211_v13  ;;  %v765_v13 = vmul.f32 %v1603_v43, %v699_v62 }
 0x14a   : > { %1049 = vadd.xlane.f32.xlu1 %v958_v12  ;;  %824 = vadd.xlane.f32.xlu2 %v749_v56  ;;  %v564_v12 = vpop.f32.mrf.mxu1 }
 0x14b   : > { %886 = vadd.xlane.f32.xlu0 %v780_v14  ;;  %v516_v14 = vpop.f32.mrf.mxu0 }
 0x14d   : > { %v1002_v30 = vpop.xlane.xlu1 %1001  ;;  %v843_v37 = vpop.xlane.xlu2 %842 }
 0x14e   : > { %v1066_v38 = vpop.xlane.xlu0 %1065  ;;  %v1127_v44 = vsel %vm1123_vm2, %v809_v35, %v1002_v30  ;;  %v700_v35 = vmax.f32 %v564_v12, 0.0  ;;  %v942_v12 = vmul.f32 %v1601_v42, %v683_v49 }
 0x14f   : > { %v1159_v2 = vsel %vm1123_vm2, %v873_v34, %v1066_v38  ;;  %v1195_v53 = vadd.f32 %v1751_v59, %v1127_v44 }
 0x150   : > { %v1227_v56 = vadd.f32 %v1751_v59, %v1159_v2  ;;  %v766_v2 = vmul.f32 %v1603_v43, %v700_v35 }
 0x151   : > { %1260 = vst.msk [vmem:[%s1758_s30 + $0x18] sm:$0xff] %vm1256_vm3, %v1195_v53  ;;  %v959_v53 = vmul.f32 %v1601_v42, %v700_v35  ;;  %v1914_v35 = vpop.f32.mrf.mxu3 }
 0x152   : > { %1292 = vst.msk [vmem:[%s1758_s30 + $0x118] sm:$0xff] %vm1256_vm3, %v1227_v56  ;;  %888 = vadd.xlane.f32.xlu1 %v781_v50  ;;  %920 = vadd.xlane.f32.xlu2 %v797_v52  ;;  %v1905_v50 = vpop.f32.mrf.mxu2 }
 0x153   : > { %856 = vadd.xlane.f32.xlu0 %v765_v13  ;;  %v684_v13 = vmax.f32 %v516_v14, 0.0 }
 0x155   : > { %v1898_v30 = vpop.xlane.xlu1 %906  ;;  %v1004_v34 = vpop.xlane.xlu2 %1003  ;;  %v943_v49 = vmul.f32 %v1601_v42, %v684_v13 }
 0x156   : > { %v1036_v38 = vpop.xlane.xlu0 %1035  ;;  %v1128_v44 = vsel %vm1123_vm2, %v811_v5, %v1004_v34  ;;  %v2332_v5 = vmax.f32 %v1905_v50, 0.0 }
 0x157   : > { %v1144_v62 = vsel %vm1123_vm2, %v843_v37, %v1036_v38  ;;  %v1196_v56 = vadd.f32 %v1751_v59, %v1128_v44 }
 0x158   : > { %v1212_v52 = vadd.f32 %v1751_v59, %v1144_v62  ;;  %v782_v44 = vmul.f32 %v1603_v43, %v2332_v5  ;;  %v750_v62 = vmul.f32 %v1603_v43, %v684_v13 }
 0x159   : > { %1261 = vst.msk [vmem:[%s1758_s30 + $0x20] sm:$0xff] %vm1256_vm3, %v1196_v56 }
 0x15a   : > { %1277 = vst.msk [vmem:[%s1758_s30 + $0xa0] sm:$0xff] %vm1256_vm3, %v1212_v52  ;;  %858 = vadd.xlane.f32.xlu1 %v766_v2  ;;  %1051 = vadd.xlane.f32.xlu2 %v959_v53  ;;  %v567_v2 = vpop.f32.mrf.mxu1  ;;  %v519_v53 = vpop.f32.mrf.mxu0  ;;  %v2323_v52 = vmax.f32 %v1914_v35, 0.0 }
 0x15b   : > { %1017 = vadd.xlane.f32.xlu0 %v942_v12  ;;  %v701_v14 = vmax.f32 %v567_v2, 0.0  ;;  %v685_v56 = vmax.f32 %v519_v53, 0.0  ;;  %v1940_v53 = vpop.f32.mrf.mxu2 }
 0x15c   : > { %v2337_v63 = vmax.f32 %v1940_v53, 0.0 }
 0x15d   : > { %v1038_v37 = vpop.xlane.xlu1 %1037  ;;  %v813_v34 = vpop.xlane.xlu2 %812  ;;  %v767_v60 = vmul.f32 %v1603_v43, %v701_v14  ;;  %v751_v22 = vmul.f32 %v1603_v43, %v685_v56  ;;  %v944_v19 = vmul.f32 %v1601_v42, %v685_v56 }
 0x15e   : > { %v1916_v38 = vpop.xlane.xlu0 %874  ;;  %v976_v18 = vmul.f32 %v1601_v42, %v2337_v63  ;;  %v2346_v63 = vmax.f32 %v1715_v25, 0.0  ;;  %v2347_v25 = vmax.f32 %v1846_v16, 0.0 }
 0x162   : > { %890 = vadd.xlane.f32.xlu2 %v782_v44  ;;  %1019 = vadd.xlane.f32.xlu1 %v943_v49  ;;  %v798_v44 = vmul.f32 %v1603_v43, %v2323_v52  ;;  %v1934_v49 = vpop.f32.mrf.mxu3  ;;  %v570_v58 = vpop.f32.mrf.mxu1 }
 0x163   : > { %826 = vadd.xlane.f32.xlu0 %v750_v62  ;;  %v2327_v2 = vmax.f32 %v1934_v49, 0.0  ;;  %v522_v8 = vpop.f32.mrf.mxu0 }
 0x165   : > { %v1924_v12 = vpop.xlane.xlu1 %876  ;;  %v1926_v36 = vpop.xlane.xlu2 %908 }
 0x166   : > { %v845_v48 = vpop.xlane.xlu0 %844 }
 0x167   : > { %v1145_v13 = vsel %vm1123_vm2, %v845_v48, %v1038_v37 }
 0x168   : > { %v1213_v62 = vadd.f32 %v1751_v59, %v1145_v13  ;;  %v799_v13 = vmul.f32 %v1603_v43, %v2327_v2 }
 0x16a   : > { %1278 = vst.msk [vmem:[%s1758_s30 + $0xa8] sm:$0xff] %vm1256_vm3, %v1213_v62  ;;  %860 = vadd.xlane.f32.xlu2 %v767_v60  ;;  %828 = vadd.xlane.f32.xlu1 %v751_v22  ;;  %v960_v22 = vmul.f32 %v1601_v42, %v701_v14 }
 0x16b   : > { %922 = vadd.xlane.f32.xlu0 %v798_v44 }
 0x16d   : > { %v847_v48 = vpop.xlane.xlu1 %846  ;;  %v1040_v37 = vpop.xlane.xlu2 %1039 }
 0x16e   : > { %v1006_v28 = vpop.xlane.xlu0 %1005  ;;  %v1146_v52 = vsel %vm1123_vm2, %v847_v48, %v1040_v37  ;;  %v702_v48 = vmax.f32 %v570_v58, 0.0  ;;  %v686_v37 = vmax.f32 %v522_v8, 0.0  ;;  %v1966_v58 = vpop.f32.mrf.mxu3 }
 0x16f   : > { %v1129_v62 = vsel %vm1123_vm2, %v813_v34, %v1006_v28  ;;  %v1214_v60 = vadd.f32 %v1751_v59, %v1146_v52  ;;  %v2333_v28 = vmax.f32 %v1940_v53, 0.0 }
 0x170   : > { %v1197_v44 = vadd.f32 %v1751_v59, %v1129_v62  ;;  %v961_v62 = vmul.f32 %v1601_v42, %v702_v48  ;;  %v752_v56 = vmul.f32 %v1603_v43, %v686_v37 }
 0x171   : > { %1279 = vst.msk [vmem:[%s1758_s30 + $0xb0] sm:$0xff] %vm1256_vm3, %v1214_v60 }
 0x172   : > { %1262 = vst.msk [vmem:[%s1758_s30 + $0x28] sm:$0xff] %vm1256_vm3, %v1197_v44  ;;  %1021 = vadd.xlane.f32.xlu2 %v944_v19  ;;  %924 = vadd.xlane.f32.xlu1 %v799_v13  ;;  %v783_v19 = vmul.f32 %v1603_v43, %v2333_v28  ;;  %v1964_v13 = vpop.f32.mrf.mxu2  ;;  %v2334_v44 = vmax.f32 %v1966_v58, 0.0 }
 0x173   : > { %1053 = vadd.xlane.f32.xlu0 %v960_v22  ;;  %v2335_v22 = vmax.f32 %v1964_v13, 0.0  ;;  %v2336_v21 = vmax.f32 %v1964_v13, 0.0 }
 0x175   : > { %v1956_v34 = vpop.xlane.xlu2 %878  ;;  %v1008_v14 = vpop.xlane.xlu1 %1007  ;;  %v784_v54 = vmul.f32 %v1603_v43, %v2335_v22  ;;  %v977_v26 = vmul.f32 %v1601_v42, %v2336_v21 }
 0x176   : > { %v815_v52 = vpop.xlane.xlu0 %814  ;;  %v525_v22 = vpop.f32.mrf.mxu0 }
 0x177   : > { %v1130_v60 = vsel %vm1123_vm2, %v815_v52, %v1008_v14 }
 0x178   : > { %v1198_v8 = vadd.f32 %v1751_v59, %v1130_v60  ;;  %v800_v60 = vmul.f32 %v1603_v43, %v2334_v44 }
 0x17a   : > { %1263 = vst.msk [vmem:[%s1758_s30 + $0x30] sm:$0xff] %vm1256_vm3, %v1198_v8  ;;  %1055 = vadd.xlane.f32.xlu1 %v961_v62  ;;  %830 = vadd.xlane.f32.xlu2 %v752_v56  ;;  %v573_v8 = vpop.f32.mrf.mxu1  ;;  %v768_v62 = vmul.f32 %v1603_v43, %v702_v48 }
 0x17b   : > { %892 = vadd.xlane.f32.xlu0 %v783_v19  ;;  %v703_v56 = vmax.f32 %v573_v8, 0.0  ;;  %v2001_v8 = vpop.f32.mrf.mxu2 }
 0x17d   : > { %v849_v14 = vpop.xlane.xlu2 %848  ;;  %v817_v52 = vpop.xlane.xlu1 %816  ;;  %v769_v5 = vmul.f32 %v1603_v43, %v703_v56 }
 0x17e   : > { %v1973_v2 = vpop.xlane.xlu0 %910 }
 0x182   : > { %894 = vadd.xlane.f32.xlu1 %v784_v54  ;;  %926 = vadd.xlane.f32.xlu2 %v800_v60  ;;  %v968_v54 = vmul.f32 %v1601_v42, %v709_v27  ;;  %v945_v60 = vmul.f32 %v1601_v42, %v686_v37  ;;  %v962_v27 = vmul.f32 %v1601_v42, %v703_v56  ;;  %v2004_v37 = vpop.f32.mrf.mxu3 }
 0x183   : > { %862 = vadd.xlane.f32.xlu0 %v768_v62 }
 0x185   : > { %v1010_v19 = vpop.xlane.xlu2 %1009  ;;  %v1982_v9 = vpop.xlane.xlu1 %912 }
 0x186   : > { %v1042_v57 = vpop.xlane.xlu0 %1041  ;;  %v1131_v1 = vsel %vm1123_vm2, %v817_v52, %v1010_v19  ;;  %v687_v52 = vmax.f32 %v525_v22, 0.0  ;;  %v735_v22 = vmax.f32 %v2004_v37, 0.0 }
 0x187   : > { %v1147_v28 = vsel %vm1123_vm2, %v849_v14, %v1042_v57  ;;  %v1199_v44 = vadd.f32 %v1751_v59, %v1131_v1 }
 0x188   : > { %v1215_v48 = vadd.f32 %v1751_v59, %v1147_v28  ;;  %v946_v28 = vmul.f32 %v1601_v42, %v687_v52  ;;  %v753_v24 = vmul.f32 %v1603_v43, %v687_v52  ;;  %v801_v56 = vmul.f32 %v1603_v43, %v735_v22 }
 0x189   : > { %1264 = vst.msk [vmem:[%s1758_s30 + $0x38] sm:$0xff] %vm1256_vm3, %v1199_v44  ;;  %v967_v52 = vmul.f32 %v1601_v42, %v708_v20  ;;  %v970_v20 = vmul.f32 %v1601_v42, %v711_v31  ;;  %v974_v31 = vmul.f32 %v1601_v42, %v715_v61 }
 0x18a   : > { %1280 = vst.msk [vmem:[%s1758_s30 + $0xb8] sm:$0xff] %vm1256_vm3, %v1215_v48  ;;  %864 = vadd.xlane.f32.xlu1 %v769_v5  ;;  %1069 = vadd.xlane.f32.xlu2 %v968_v54  ;;  %v719_v5 = vmax.f32 %v2001_v8, 0.0 }
 0x18b   : > { %1023 = vadd.xlane.f32.xlu0 %v945_v60 }
 0x18c   : > { %v785_v48 = vmul.f32 %v1603_v43, %v719_v5 }
 0x18d   : > { %v1044_v57 = vpop.xlane.xlu1 %1043  ;;  %v819_v14 = vpop.xlane.xlu2 %818 }
 0x18e   : > { %v1997_v1 = vpop.xlane.xlu0 %880 }
 0x192   : > { %1057 = vadd.xlane.f32.xlu2 %v962_v27  ;;  %1025 = vadd.xlane.f32.xlu1 %v946_v28 }
 0x193   : > { %832 = vadd.xlane.f32.xlu0 %v753_v24 }
 0x195   : > { %v2008_v44 = vpop.xlane.xlu1 %882  ;;  %v2010_v62 = vpop.xlane.xlu2 %914 }
 0x196   : > { %v851_v19 = vpop.xlane.xlu0 %850 }
 0x197   : > { %v1148_v54 = vsel %vm1123_vm2, %v851_v19, %v1044_v57 }
 0x198   : > { %v1216_v60 = vadd.f32 %v1751_v59, %v1148_v54 }
 0x19a   : > { %1281 = vst.msk [vmem:[%s1758_s30 + $0xc0] sm:$0xff] %vm1256_vm3, %v1216_v60  ;;  %896 = vadd.xlane.f32.xlu2 %v785_v48  ;;  %1067 = vadd.xlane.f32.xlu1 %v967_v52  ;;  %v969_v48 = vmul.f32 %v1601_v42, %v710_v45  ;;  %v972_v45 = vmul.f32 %v1601_v42, %v713_v23  ;;  %v2338_v23 = vmax.f32 %v1905_v50, 0.0  ;;  %v2339_v50 = vmax.f32 %v1625_v0, 0.0 }
 0x19b   : > { %928 = vadd.xlane.f32.xlu0 %v801_v56  ;;  %v2341_v0 = vmax.f32 %v1695_v6, 0.0 }
 0x19c   : > { %v975_v61 = vmul.f32 %v1601_v42, %v2338_v23 }
 0x19d   : > { %v853_v28 = vpop.xlane.xlu1 %852  ;;  %v1046_v24 = vpop.xlane.xlu2 %1045 }
 0x19e   : > { %v1012_v57 = vpop.xlane.xlu0 %1011  ;;  %v1149_v8 = vsel %vm1123_vm2, %v853_v28, %v1046_v24 }
 0x19f   : > { %v1132_v43 = vsel %vm1123_vm2, %v819_v14, %v1012_v57  ;;  %v1217_v27 = vadd.f32 %v1751_v59, %v1149_v8 }
 0x1a0   : > { %v1200_v19 = vadd.f32 %v1751_v59, %v1132_v43 }
 0x1a1   : > { %1282 = vst.msk [vmem:[%s1758_s30 + $0xc8] sm:$0xff] %vm1256_vm3, %v1217_v27  ;;  %v980_v27 = vmul.f32 %v1601_v42, %v2339_v50  ;;  %v2349_v50 = vmax.f32 %v1796_v41, 0.0  ;;  %v2351_v41 = vmax.f32 %v1914_v35, 0.0  ;;  %v994_v35 = vmul.f32 %v1601_v42, %v735_v22 }
 0x1a2   : > { %1265 = vst.msk [vmem:[%s1758_s30 + $0x40] sm:$0xff] %vm1256_vm3, %v1200_v19  ;;  %1075 = vadd.xlane.f32.xlu2 %v971_v10  ;;  %1073 = vadd.xlane.f32.xlu1 %v970_v20  ;;  %v2340_v19 = vmax.f32 %v1613_v55, 0.0  ;;  %v978_v20 = vmul.f32 %v1601_v42, %v719_v5  ;;  %v983_v55 = vmul.f32 %v1601_v42, %v2341_v0  ;;  %v2343_v5 = vmax.f32 %v1645_v17, 0.0 }
 0x1a3   : > { %1071 = vadd.xlane.f32.xlu0 %v969_v48  ;;  %v2345_v17 = vmax.f32 %v1740_v46, 0.0  ;;  %v991_v0 = vmul.f32 %v1601_v42, %v2351_v41 }
 0x1a4   : > { %v979_v10 = vmul.f32 %v1601_v42, %v2340_v19 }
 0x1a5   : > { %v2040_v14 = vpop.xlane.xlu2 %884  ;;  %v1014_v39 = vpop.xlane.xlu1 %1013 }
 0x1a6   : > { %v821_v47 = vpop.xlane.xlu0 %820 }
 0x1a7   : > { %v1133_v11 = vsel %vm1123_vm2, %v821_v47, %v1014_v39 }
 0x1a8   : > { %v1201_v54 = vadd.f32 %v1751_v59, %v1133_v11  ;;  %v2342_v11 = vmax.f32 %v1675_v51, 0.0  ;;  %v2344_v51 = vmax.f32 %v1767_v7, 0.0 }
 0x1aa   : > { %1266 = vst.msk [vmem:[%s1758_s30 + $0x48] sm:$0xff] %vm1256_vm3, %v1201_v54  ;;  %1081 = vadd.xlane.f32.xlu2 %v974_v31  ;;  %1079 = vadd.xlane.f32.xlu1 %v973_v40  ;;  %v982_v54 = vmul.f32 %v1601_v42, %v2342_v11  ;;  %v981_v31 = vmul.f32 %v1601_v42, %v2343_v5 }
 0x1ab   : > { %1077 = vadd.xlane.f32.xlu0 %v972_v45  ;;  %v986_v21 = vmul.f32 %v1601_v42, %v2344_v51 }
 0x1ad   : > { %v855_v56 = vpop.xlane.xlu2 %854  ;;  %v823_v60 = vpop.xlane.xlu1 %822 }
 0x1ae   : > { %v2055_v52 = vpop.xlane.xlu0 %916 }
 0x1b2   : > { %1087 = vadd.xlane.f32.xlu2 %v977_v26  ;;  %1085 = vadd.xlane.f32.xlu1 %v976_v18  ;;  %v985_v26 = vmul.f32 %v1601_v42, %v2345_v17  ;;  %v984_v18 = vmul.f32 %v1601_v42, %v2346_v63 }
 0x1b3   : > { %1083 = vadd.xlane.f32.xlu0 %v975_v61 }
 0x1b5   : > { %v1016_v28 = vpop.xlane.xlu2 %1015  ;;  %v2066_v24 = vpop.xlane.xlu1 %918 }
 0x1b6   : > { %v1048_v57 = vpop.xlane.xlu0 %1047  ;;  %v1134_v13 = vsel %vm1123_vm2, %v823_v60, %v1016_v28 }
 0x1b7   : > { %v1150_v8 = vsel %vm1123_vm2, %v855_v56, %v1048_v57  ;;  %v1202_v53 = vadd.f32 %v1751_v59, %v1134_v13 }
 0x1b8   : > { %v1218_v43 = vadd.f32 %v1751_v59, %v1150_v8  ;;  %v989_v8 = vmul.f32 %v1601_v42, %v2347_v25 }
 0x1b9   : > { %1267 = vst.msk [vmem:[%s1758_s30 + $0x50] sm:$0xff] %vm1256_vm3, %v1202_v53  ;;  %v2348_v53 = vmax.f32 %v1826_v29, 0.0 }
 0x1ba   : > { %1283 = vst.msk [vmem:[%s1758_s30 + $0xd0] sm:$0xff] %vm1256_vm3, %v1218_v43  ;;  %1093 = vadd.xlane.f32.xlu2 %v980_v27  ;;  %1091 = vadd.xlane.f32.xlu1 %v979_v10  ;;  %v987_v27 = vmul.f32 %v1601_v42, %v2349_v50 }
 0x1bb   : > { %1089 = vadd.xlane.f32.xlu0 %v978_v20  ;;  %v988_v43 = vmul.f32 %v1601_v42, %v2348_v53 }
 0x1bd   : > { %v1050_v48 = vpop.xlane.xlu1 %1049  ;;  %v825_v39 = vpop.xlane.xlu2 %824 }
 0x1be   : > { %v2083_v47 = vpop.xlane.xlu0 %886 }
 0x1c2   : > { %1099 = vadd.xlane.f32.xlu2 %v983_v55  ;;  %1097 = vadd.xlane.f32.xlu1 %v982_v54  ;;  %v2352_v55 = vmax.f32 %v1877_v32, 0.0 }
 0x1c3   : > { %1095 = vadd.xlane.f32.xlu0 %v981_v31  ;;  %v2353_v31 = vmax.f32 %v1966_v58, 0.0 }
 0x1c4   : > { %v990_v11 = vmul.f32 %v1601_v42, %v2352_v55 }
 0x1c5   : > { %v2094_v40 = vpop.xlane.xlu1 %888  ;;  %v2096_v45 = vpop.xlane.xlu2 %920  ;;  %v993_v32 = vmul.f32 %v1601_v42, %v2353_v31 }
 0x1c6   : > { %v857_v56 = vpop.xlane.xlu0 %856 }
 0x1c7   : > { %v1151_v6 = vsel %vm1123_vm2, %v857_v56, %v1050_v48  ;;  %v2350_v48 = vmax.f32 %v1934_v49, 0.0 }
 0x1c8   : > { %v1219_v60 = vadd.f32 %v1751_v59, %v1151_v6 }
 0x1ca   : > { %1284 = vst.msk [vmem:[%s1758_s30 + $0xd8] sm:$0xff] %vm1256_vm3, %v1219_v60  ;;  %1105 = vadd.xlane.f32.xlu2 %v986_v21  ;;  %1103 = vadd.xlane.f32.xlu1 %v985_v26 }
 0x1cb   : > { %1101 = vadd.xlane.f32.xlu0 %v984_v18 }
 0x1cd   : > { %v859_v23 = vpop.xlane.xlu1 %858  ;;  %v1052_v61 = vpop.xlane.xlu2 %1051 }
 0x1ce   : > { %v1018_v7 = vpop.xlane.xlu0 %1017  ;;  %v1152_v28 = vsel %vm1123_vm2, %v859_v23, %v1052_v61 }
 0x1cf   : > { %v1135_v46 = vsel %vm1123_vm2, %v825_v39, %v1018_v7  ;;  %v1220_v57 = vadd.f32 %v1751_v59, %v1152_v28  ;;  %v992_v39 = vmul.f32 %v1601_v42, %v2350_v48 }
 0x1d0   : > { %v1203_v13 = vadd.f32 %v1751_v59, %v1135_v46 }
 0x1d1   : > { %1285 = vst.msk [vmem:[%s1758_s30 + $0xe0] sm:$0xff] %vm1256_vm3, %v1220_v57 }
 0x1d2   : > { %1268 = vst.msk [vmem:[%s1758_s30 + $0x58] sm:$0xff] %vm1256_vm3, %v1203_v13  ;;  %1111 = vadd.xlane.f32.xlu2 %v989_v8  ;;  %1109 = vadd.xlane.f32.xlu1 %v988_v43 }
 0x1d3   : > { %1107 = vadd.xlane.f32.xlu0 %v987_v27 }
 0x1d5   : > { %v2128_v19 = vpop.xlane.xlu2 %890  ;;  %v1020_v16 = vpop.xlane.xlu1 %1019 }
 0x1d6   : > { %v827_v10 = vpop.xlane.xlu0 %826 }
 0x1d7   : > { %v1136_v29 = vsel %vm1123_vm2, %v827_v10, %v1020_v16 }
 0x1d8   : > { %v1204_v20 = vadd.f32 %v1751_v59, %v1136_v29 }
 0x1da   : > { %1269 = vst.msk [vmem:[%s1758_s30 + $0x60] sm:$0xff] %vm1256_vm3, %v1204_v20  ;;  %1117 = vadd.xlane.f32.xlu2 %v992_v39  ;;  %1115 = vadd.xlane.f32.xlu1 %v991_v0 }
 0x1db   : > { %1113 = vadd.xlane.f32.xlu0 %v990_v11 }
 0x1dd   : > { %v861_v54 = vpop.xlane.xlu2 %860  ;;  %v829_v5 = vpop.xlane.xlu1 %828 }
 0x1de   : > { %v2143_v49 = vpop.xlane.xlu0 %922 }
 0x1e2   : > { %1121 = vadd.xlane.f32.xlu1 %v994_v35 }
 0x1e3   : > { %1119 = vadd.xlane.f32.xlu0 %v993_v32 }
 0x1e5   : > { %v1022_v56 = vpop.xlane.xlu2 %1021  ;;  %v2151_v6 = vpop.xlane.xlu1 %924 }
 0x1e6   : > { %v1054_v60 = vpop.xlane.xlu0 %1053  ;;  %v1137_v51 = vsel %vm1123_vm2, %v829_v5, %v1022_v56 }
 0x1e7   : > { %v1153_v21 = vsel %vm1123_vm2, %v861_v54, %v1054_v60  ;;  %v1205_v17 = vadd.f32 %v1751_v59, %v1137_v51 }
 0x1e8   : > { %v1221_v37 = vadd.f32 %v1751_v59, %v1153_v21 }
 0x1e9   : > { %1270 = vst.msk [vmem:[%s1758_s30 + $0x68] sm:$0xff] %vm1256_vm3, %v1205_v17 }
 0x1ea   : > { %1286 = vst.msk [vmem:[%s1758_s30 + $0xe8] sm:$0xff] %vm1256_vm3, %v1221_v37 }
 0x1ed   : > { %v1056_v42 = vpop.xlane.xlu1 %1055  ;;  %v831_v58 = vpop.xlane.xlu2 %830 }
 0x1ee   : > { %v893_v22 = vpop.xlane.xlu0 %892 }
 0x1f5   : > { %v895_v26 = vpop.xlane.xlu1 %894  ;;  %v2161_v63 = vpop.xlane.xlu2 %926 }
 0x1f6   : > { %v863_v18 = vpop.xlane.xlu0 %862 }
 0x1f7   : > { %v1154_v23 = vsel %vm1123_vm2, %v863_v18, %v1056_v42 }
 0x1f8   : > { %v1222_v61 = vadd.f32 %v1751_v59, %v1154_v23 }
 0x1fa   : > { %1287 = vst.msk [vmem:[%s1758_s30 + $0xf0] sm:$0xff] %vm1256_vm3, %v1222_v61 }
 0x1fd   : > { %v865_v7 = vpop.xlane.xlu1 %864  ;;  %v1070_v28 = vpop.xlane.xlu2 %1069 }
 0x1fe   : > { %v1024_v46 = vpop.xlane.xlu0 %1023  ;;  %v1161_v57 = vsel %vm1123_vm2, %v1924_v12, %v1070_v28 }
 0x1ff   : > { %v1138_v13 = vsel %vm1123_vm2, %v831_v58, %v1024_v46  ;;  %v1229_v25 = vadd.f32 %v1751_v59, %v1161_v57 }
 0x200   : > { %v1206_v8 = vadd.f32 %v1751_v59, %v1138_v13 }
 0x201   : > { %1294 = vst.msk [vmem:[%s1758_s30 + $0x128] sm:$0xff] %vm1256_vm3, %v1229_v25 }
 0x202   : > { %1271 = vst.msk [vmem:[%s1758_s30 + $0x70] sm:$0xff] %vm1256_vm3, %v1206_v8 }
 0x205   : > { %v1058_v53 = vpop.xlane.xlu2 %1057  ;;  %v1026_v43 = vpop.xlane.xlu1 %1025 }
 0x206   : > { %v1155_v50 = vsel %vm1123_vm2, %v865_v7, %v1058_v53  ;;  %v833_v27 = vpop.xlane.xlu0 %832 }
 0x207   : > { %v1223_v16 = vadd.f32 %v1751_v59, %v1155_v50  ;;  %v1139_v12 = vsel %vm1123_vm2, %v833_v27, %v1026_v43 }
 0x208   : > { %v1207_v10 = vadd.f32 %v1751_v59, %v1139_v12 }
 0x209   : > { %1288 = vst.msk [vmem:[%s1758_s30 + $0xf8] sm:$0xff] %vm1256_vm3, %v1223_v16 }
 0x20a   : > { %1272 = vst.msk [vmem:[%s1758_s30 + $0x78] sm:$0xff] %vm1256_vm3, %v1207_v10 }
 0x20d   : > { %v897_v29 = vpop.xlane.xlu2 %896  ;;  %v1068_v20 = vpop.xlane.xlu1 %1067 }
 0x20e   : > { %v1160_v48 = vsel %vm1123_vm2, %v1916_v38, %v1068_v20  ;;  %v2186_v39 = vpop.xlane.xlu0 %928 }
 0x20f   : > { %v1228_v41 = vadd.f32 %v1751_v59, %v1160_v48 }
 0x211   : > { %1293 = vst.msk [vmem:[%s1758_s30 + $0x120] sm:$0xff] %vm1256_vm3, %v1228_v41 }
 0x215   : > { %v1076_v0 = vpop.xlane.xlu2 %1075  ;;  %v1074_v55 = vpop.xlane.xlu1 %1073 }
 0x216   : > { %v1164_v11 = vsel %vm1123_vm2, %v2008_v44, %v1076_v0  ;;  %v1163_v54 = vsel %vm1123_vm2, %v1997_v1, %v1074_v55  ;;  %v1072_v5 = vpop.xlane.xlu0 %1071 }
 0x217   : > { %v1232_v35 = vadd.f32 %v1751_v59, %v1164_v11  ;;  %v1231_v38 = vadd.f32 %v1751_v59, %v1163_v54  ;;  %v1162_v31 = vsel %vm1123_vm2, %v1956_v34, %v1072_v5 }
 0x218   : > { %v1230_v32 = vadd.f32 %v1751_v59, %v1162_v31 }
 0x219   : > { %1297 = vst.msk [vmem:[%s1758_s30 + $0x140] sm:$0xff] %vm1256_vm3, %v1232_v35 }
 0x21a   : > { %1296 = vst.msk [vmem:[%s1758_s30 + $0x138] sm:$0xff] %vm1256_vm3, %v1231_v38 }
 0x21b   : > { %1295 = vst.msk [vmem:[%s1758_s30 + $0x130] sm:$0xff] %vm1256_vm3, %v1230_v32 }
 0x21d   : > { %v1082_v1 = vpop.xlane.xlu2 %1081  ;;  %v1080_v44 = vpop.xlane.xlu1 %1079 }
 0x21e   : > { %v1167_v56 = vsel %vm1123_vm2, %v2094_v40, %v1082_v1  ;;  %v1166_v60 = vsel %vm1123_vm2, %v2083_v47, %v1080_v44  ;;  %v1078_v51 = vpop.xlane.xlu0 %1077 }
 0x21f   : > { %v1235_v34 = vadd.f32 %v1751_v59, %v1167_v56  ;;  %v1234_v21 = vadd.f32 %v1751_v59, %v1166_v60  ;;  %v1165_v17 = vsel %vm1123_vm2, %v2040_v14, %v1078_v51 }
 0x220   : > { %v1233_v37 = vadd.f32 %v1751_v59, %v1165_v17 }
 0x221   : > { %1300 = vst.msk [vmem:[%s1758_s30 + $0x158] sm:$0xff] %vm1256_vm3, %v1235_v34 }
 0x222   : > { %1299 = vst.msk [vmem:[%s1758_s30 + $0x150] sm:$0xff] %vm1256_vm3, %v1234_v21 }
 0x223   : > { %1298 = vst.msk [vmem:[%s1758_s30 + $0x148] sm:$0xff] %vm1256_vm3, %v1233_v37 }
 0x225   : > { %v1088_v47 = vpop.xlane.xlu2 %1087  ;;  %v1086_v40 = vpop.xlane.xlu1 %1085 }
 0x226   : > { %v1170_v42 = vsel %vm1123_vm2, %v895_v26, %v1088_v47  ;;  %v1169_v58 = vsel %vm1123_vm2, %v893_v22, %v1086_v40  ;;  %v1084_v18 = vpop.xlane.xlu0 %1083 }
 0x227   : > { %v1238_v23 = vadd.f32 %v1751_v59, %v1170_v42  ;;  %v1237_v14 = vadd.f32 %v1751_v59, %v1169_v58  ;;  %v1168_v61 = vsel %vm1123_vm2, %v2128_v19, %v1084_v18 }
 0x228   : > { %v1236_v7 = vadd.f32 %v1751_v59, %v1168_v61 }
 0x229   : > { %1303 = vst.msk [vmem:[%s1758_s30 + $0x170] sm:$0xff] %vm1256_vm3, %v1238_v23 }
 0x22a   : > { %1302 = vst.msk [vmem:[%s1758_s30 + $0x168] sm:$0xff] %vm1256_vm3, %v1237_v14 }
 0x22b   : > { %1301 = vst.msk [vmem:[%s1758_s30 + $0x160] sm:$0xff] %vm1256_vm3, %v1236_v7 }
 0x22d   : > { %v1094_v22 = vpop.xlane.xlu2 %1093  ;;  %v1092_v26 = vpop.xlane.xlu1 %1091 }
 0x22e   : > { %v1173_v28 = vsel %vm1123_vm2, %v1786_v33, %v1094_v22  ;;  %v1172_v46 = vsel %vm1123_vm2, %v1775_v15, %v1092_v26  ;;  %v1090_v57 = vpop.xlane.xlu0 %1089 }
 0x22f   : > { %v1241_v19 = vadd.f32 %v1751_v59, %v1173_v28  ;;  %v1240_v13 = vadd.f32 %v1751_v59, %v1172_v46  ;;  %v1171_v25 = vsel %vm1123_vm2, %v897_v29, %v1090_v57 }
 0x230   : > { %v1239_v8 = vadd.f32 %v1751_v59, %v1171_v25 }
 0x231   : > { %1306 = vst.msk [vmem:[%s1758_s30 + $0x188] sm:$0xff] %vm1256_vm3, %v1241_v19 }
 0x232   : > { %1305 = vst.msk [vmem:[%s1758_s30 + $0x180] sm:$0xff] %vm1256_vm3, %v1240_v13 }
 0x233   : > { %1304 = vst.msk [vmem:[%s1758_s30 + $0x178] sm:$0xff] %vm1256_vm3, %v1239_v8 }
 0x235   : > { %v1100_v33 = vpop.xlane.xlu2 %1099  ;;  %v1098_v15 = vpop.xlane.xlu1 %1097 }
 0x236   : > { %v1176_v53 = vsel %vm1123_vm2, %v1898_v30, %v1100_v33  ;;  %v1175_v43 = vsel %vm1123_vm2, %v1866_v3, %v1098_v15  ;;  %v1096_v50 = vpop.xlane.xlu0 %1095 }
 0x237   : > { %v1244_v27 = vadd.f32 %v1751_v59, %v1176_v53  ;;  %v1243_v16 = vadd.f32 %v1751_v59, %v1175_v43  ;;  %v1174_v12 = vsel %vm1123_vm2, %v1814_v4, %v1096_v50 }
 0x238   : > { %v1242_v10 = vadd.f32 %v1751_v59, %v1174_v12  ;;  %v1465_v59 = vld [vmem:[%s2316_s3] ss:$0 sm:$0xff] }
 0x239   : > { %1309 = vst.msk [vmem:[%s1758_s30 + $0x1a0] sm:$0xff] %vm1256_vm3, %v1244_v27 }
 0x23a   : > { %1308 = vst.msk [vmem:[%s1758_s30 + $0x198] sm:$0xff] %vm1256_vm3, %v1243_v16 }
 0x23b   : > { %1307 = vst.msk [vmem:[%s1758_s30 + $0x190] sm:$0xff] %vm1256_vm3, %v1242_v10 }
 0x23d   : > { %v1106_v3 = vpop.xlane.xlu2 %1105  ;;  %v1104_v30 = vpop.xlane.xlu1 %1103 }
 0x23e   : > { %v1179_v29 = vsel %vm1123_vm2, %v1982_v9, %v1106_v3  ;;  %v1178_v20 = vsel %vm1123_vm2, %v1973_v2, %v1104_v30  ;;  %v1102_v48 = vpop.xlane.xlu0 %1101 }
 0x23f   : > { %v1247_v4 = vadd.f32 %v1465_v59, %v1179_v29  ;;  %v1246_v41 = vadd.f32 %v1465_v59, %v1178_v20  ;;  %v1177_v0 = vsel %vm1123_vm2, %v1926_v36, %v1102_v48 }
 0x240   : > { %v1245_v55 = vadd.f32 %v1465_v59, %v1177_v0 }
 0x241   : > { %1312 = vst.msk [vmem:[%s1758_s30 + $0x1b8] sm:$0xff] %vm1256_vm3, %v1247_v4 }
 0x242   : > { %1311 = vst.msk [vmem:[%s1758_s30 + $0x1b0] sm:$0xff] %vm1256_vm3, %v1246_v41 }
 0x243   : > { %1310 = vst.msk [vmem:[%s1758_s30 + $0x1a8] sm:$0xff] %vm1256_vm3, %v1245_v55 }
 0x245   : > { %v1112_v9 = vpop.xlane.xlu2 %1111  ;;  %v1110_v2 = vpop.xlane.xlu1 %1109 }
 0x246   : > { %v1182_v11 = vsel %vm1123_vm2, %v2066_v24, %v1112_v9  ;;  %v1181_v54 = vsel %vm1123_vm2, %v2055_v52, %v1110_v2  ;;  %v1108_v5 = vpop.xlane.xlu0 %1107 }
 0x247   : > { %v1250_v35 = vadd.f32 %v1465_v59, %v1182_v11  ;;  %v1249_v36 = vadd.f32 %v1465_v59, %v1181_v54  ;;  %v1180_v38 = vsel %vm1123_vm2, %v2010_v62, %v1108_v5 }
 0x248   : > { %v1248_v31 = vadd.f32 %v1465_v59, %v1180_v38 }
 0x249   : > { %1315 = vst.msk [vmem:[%s1758_s30 + $0x1d0] sm:$0xff] %vm1256_vm3, %v1250_v35 }
 0x24a   : > { %1314 = vst.msk [vmem:[%s1758_s30 + $0x1c8] sm:$0xff] %vm1256_vm3, %v1249_v36 }
 0x24b   : > { %1313 = vst.msk [vmem:[%s1758_s30 + $0x1c0] sm:$0xff] %vm1256_vm3, %v1248_v31 }
 0x24d   : > { %v1118_v24 = vpop.xlane.xlu2 %1117  ;;  %v1116_v32 = vpop.xlane.xlu1 %1115 }
 0x24e   : > { %v1185_v52 = vsel %vm1123_vm2, %v2151_v6, %v1118_v24  ;;  %v1184_v1 = vsel %vm1123_vm2, %v2143_v49, %v1116_v32  ;;  %v1114_v44 = vpop.xlane.xlu0 %1113 }
 0x24f   : > { %v1253_v62 = vadd.f32 %v1465_v59, %v1185_v52  ;;  %v1252_v56 = vadd.f32 %v1465_v59, %v1184_v1  ;;  %v1183_v60 = vsel %vm1123_vm2, %v2096_v45, %v1114_v44 }
 0x250   : > { %v1251_v51 = vadd.f32 %v1465_v59, %v1183_v60 }
 0x251   : > { %1318 = vst.msk [vmem:[%s1758_s30 + $0x1e8] sm:$0xff] %vm1256_vm3, %v1253_v62 }
 0x252   : > { %1317 = vst.msk [vmem:[%s1758_s30 + $0x1e0] sm:$0xff] %vm1256_vm3, %v1252_v56 }
 0x253   : > { %1316 = vst.msk [vmem:[%s1758_s30 + $0x1d8] sm:$0xff] %vm1256_vm3, %v1251_v51 }
 0x255   : > { %v1122_v34 = vpop.xlane.xlu1 %1121 }
 0x256   : > { %v1187_v6 = vsel %vm1123_vm2, %v2186_v39, %v1122_v34  ;;  %v1120_v21 = vpop.xlane.xlu0 %1119 }
 0x257   : > { %v1255_v49 = vadd.f32 %v1465_v59, %v1187_v6  ;;  %v1186_v17 = vsel %vm1123_vm2, %v2161_v63, %v1120_v21 }
 0x258   : > { %v1254_v37 = vadd.f32 %v1465_v59, %v1186_v17 }
 0x259   : > { %1320 = vst.msk [vmem:[%s1758_s30 + $0x1f8] sm:$0xff] %vm1256_vm3, %v1255_v49 }
 0x25a   : > { %1319 = vst.msk [vmem:[%s1758_s30 + $0x1f0] sm:$0xff] %vm1256_vm3, %v1254_v37 }
 0x25b PF: > { %s14_s15 = sadd.s32 1, %s1472_s15  }
 0x25c   : > { %p11_p4 = scmp.ge.s32.totalorder %s14_s15, 4  }
 0x25e   :  { %13 = sbr.rel (!%p11_p4) target bundleno = 1 (0x1), region = 66 }

</bundles_post_ra>
